<compile_context>
chip_gen: v7x
topology: tpu7x:2x2x1
jax: 0.10.0
libtpu: 0.0.40
codegen_flags: <defaults>
</compile_context>

<pallas_src>
import functools

import jax
import jax.numpy as jnp
from jax.experimental import pallas as pl
from jax.experimental.pallas import tpu as pltpu


def _round_up(x, m):
    return ((x + m - 1) // m) * m


def _cdiv(a, b):
    return (a + b - 1) // b


def _probe_single_buffer():
    """Does this Pallas version accept pipeline_mode=pl.Buffered(1) on a BlockSpec?"""
    try:
        pl.BlockSpec((8, 128), lambda m: (0, 0), pipeline_mode=pl.Buffered(1))
        return True
    except Exception:
        return False


_SINGLE_BUFFER_OK = _probe_single_buffer()


@functools.lru_cache(maxsize=None)
def _vmem_budgets():
    """(vmem_limit_bytes, fused_budget_bytes), generation-aware."""
    phys = 64 * 1024 * 1024
    try:
        info = pltpu.get_tpu_info()
        phys = int(getattr(info, "vmem_capacity_bytes", phys))
    except Exception:
        pass
    if phys >= 100 * 1024 * 1024:                    # v5e / v6e: 128 MiB physical VMEM
        return 96 * 1024 * 1024, 80 * 1024 * 1024
    return 48 * 1024 * 1024, 36 * 1024 * 1024        # v7x: 64 MiB physical VMEM


# ---------------------------------------------------------------------------
# Fused multi-layer kernel: one grid step per batch tile, all layers inside.
# Weights/biases are fully resident in VMEM; activations never touch HBM.
# ---------------------------------------------------------------------------
def _fused_kernel(x_ref, *refs):
    o_ref = refs[-1]
    wb = refs[:-1]                       # (w0, b0, w1, b1, ...)
    n_layers = len(wb) // 2              # static at trace time

    act = x_ref[...].astype(jnp.bfloat16)          # bf16 MXU operand
    y = None
    for layer in range(n_layers):
        w = wb[2 * layer][...]                     # bf16 resident weights
        b = wb[2 * layer + 1][...]                 # f32 bias row (1, Np)
        y = jnp.dot(act, w, preferred_element_type=jnp.float32) + b
        act = y.astype(jnp.bfloat16)               # operand for the next layer
    o_ref[...] = y.astype(o_ref.dtype)             # final layer written from f32


def _fused_forward(xp, padded_params, *, tm, vmem_limit):
    """xp: (Bp, Kp0) padded f32 input; padded_params: [(wp bf16 (Kp,Np), bp f32 (1,Np)), ...]."""
    Bp, Kp0 = xp.shape
    np_last = padded_params[-1][0].shape[1]

    flat_args = [xp]
    for wp, bp in padded_params:
        flat_args.extend([wp, bp])

    def run(single_buffer):
        def resident_spec(shape):
            # Constant index_map -> double-buffering buys nothing; single-buffer
            # halves the weight VMEM footprint when supported.
            if single_buffer:
                return pl.BlockSpec(shape, lambda m: (0, 0),
                                    pipeline_mode=pl.Buffered(1))
            return pl.BlockSpec(shape, lambda m: (0, 0))

        in_specs = [pl.BlockSpec((tm, Kp0), lambda m: (m, 0))]
        for wp, bp in padded_params:
            kp, np_ = wp.shape
            in_specs.append(resident_spec((kp, np_)))
            in_specs.append(resident_spec((1, np_)))

        return pl.pallas_call(
            _fused_kernel,
            out_shape=jax.ShapeDtypeStruct((Bp, np_last), xp.dtype),
            grid_spec=pltpu.PrefetchScalarGridSpec(
                num_scalar_prefetch=0,
                grid=(Bp // tm,),
                in_specs=in_specs,
                out_specs=pl.BlockSpec((tm, np_last), lambda m: (m, 0)),
            ),
            compiler_params=pltpu.CompilerParams(
                dimension_semantics=("parallel",),
                vmem_limit_bytes=vmem_limit,
            ),
        )(*flat_args)

    if _SINGLE_BUFFER_OK:
        try:
            return run(True)
        except Exception:
            pass    # fall back to default double-buffered specs
    return run(False)


# ---------------------------------------------------------------------------
# Fallback: per-layer linear with (M, N, K) tiled grid (for huge layers).
# ---------------------------------------------------------------------------
def _linear_kernel(x_ref, w_ref, b_ref, o_ref, acc_ref):
    k = pl.program_id(2)

    @pl.when(k == 0)
    def _():
        acc_ref[...] = jnp.zeros_like(acc_ref)

    acc_ref[...] += jnp.dot(x_ref[...].astype(jnp.bfloat16), w_ref[...],
                            preferred_element_type=jnp.float32)

    @pl.when(k == pl.num_programs(2) - 1)
    def _():
        o_ref[...] = (acc_ref[...] + b_ref[...]).astype(o_ref.dtype)


def _largest_divisor_tile(total, cap):
    """Largest multiple-of-128 divisor of `total` (itself a multiple of 128) <= cap."""
    for cand in range(min(cap, total), 127, -128):
        if total % cand == 0:
            return cand
    return 128


def _pallas_linear_tiled(x, w, b, *, tm, vmem_limit, tk_max=512, tn_max=512):
    """y = x @ w + b with padded x:(Bp,Kp) f32, w:(Kp,Np) bf16, b:(1,Np) f32."""
    Bp, Kp = x.shape
    Kp2, Np = w.shape
    assert Kp == Kp2, (Kp, Kp2)

    tk = _largest_divisor_tile(Kp, tk_max)
    tn = _largest_divisor_tile(Np, tn_max)

    return pl.pallas_call(
        _linear_kernel,
        out_shape=jax.ShapeDtypeStruct((Bp, Np), x.dtype),
        grid_spec=pltpu.PrefetchScalarGridSpec(
            num_scalar_prefetch=0,
            grid=(Bp // tm, Np // tn, Kp // tk),
            in_specs=[
                pl.BlockSpec((tm, tk), lambda m, n, k: (m, k)),
                pl.BlockSpec((tk, tn), lambda m, n, k: (k, n)),
                pl.BlockSpec((1, tn), lambda m, n, k: (0, n)),
            ],
            out_specs=pl.BlockSpec((tm, tn), lambda m, n, k: (m, n)),
            scratch_shapes=[pltpu.VMEM((tm, tn), jnp.float32)],
        ),
        compiler_params=pltpu.CompilerParams(
            dimension_semantics=("parallel", "parallel", "arbitrary"),
            vmem_limit_bytes=vmem_limit,
        ),
    )(x, w, b)


# ---------------------------------------------------------------------------
# Module wrapper.
# ---------------------------------------------------------------------------
class FullyConnect:
    """JAX/Pallas port of models/src/operators/cnn2D.py::Fully_Connect."""

    def __init__(self, n_input, n_hidden, n_layers, *, key, dtype=jnp.float32):
        self.n_input = n_input
        if not isinstance(n_hidden, list):
            self.n_hidden = [n_hidden] * n_layers
        else:
            assert len(n_hidden) == n_layers, \
                "`n_hidden` must have the same length as n_layers"
            self.n_hidden = n_hidden
        self.n_layers = n_layers
        self.dtype = dtype

        # Deterministic init mimicking nn.Linear's uniform(-1/sqrt(fan_in), ...).
        self.params = []        # unpadded f32 (K, N) weights, (N,) biases (reference)
        self._padded = []       # padded bf16 (Kp, Np) weights, f32 (1, Np) biases
        for layer_idx in range(n_layers):
            input_dim = self.n_input if layer_idx == 0 else self.n_hidden[layer_idx - 1]
            output_dim = self.n_hidden[layer_idx]
            key, wk, bk = jax.random.split(key, 3)
            bound = 1.0 / (input_dim ** 0.5)
            # Stored as (K, N): transpose of PyTorch's (out_features, in_features).
            w = jax.random.uniform(wk, (input_dim, output_dim), dtype,
                                   minval=-bound, maxval=bound)
            b = jax.random.uniform(bk, (output_dim,), dtype,
                                   minval=-bound, maxval=bound)
            self.params.append((w, b))

            kp = _round_up(input_dim, 128)
            np_ = _round_up(output_dim, 128)
            wp = jnp.pad(w, ((0, kp - input_dim), (0, np_ - output_dim)))
            bp = jnp.pad(b, (0, np_ - output_dim)).reshape(1, np_)
            self._padded.append((wp.astype(jnp.bfloat16), bp.astype(jnp.float32)))

        self._kp0 = _round_up(self.n_input, 128)

    def __call__(self, x, *, force_per_layer=False):
        if x.ndim == 2:
            input_ = x
        else:
            input_ = x.reshape(x.shape[0], -1)     # flatten NCHW -> (B, C*H*W)
        B, K = input_.shape
        assert K == self.n_input, (K, self.n_input)

        # Sublane granularity depends on the activation dtype (f32:8, bf16:16, i8:32).
        sub = {1: 32, 2: 16, 4: 8}.get(jnp.dtype(input_.dtype).itemsize, 8)
        cap = 512                                   # larger tiles amortize grid overhead
        Bp8 = _round_up(B, sub)
        # >=2 tiles whenever the batch allows it so the "parallel" axis can shard
        # across v7x's 2 TensorCores; tm from ceil-division avoids ~2x over-padding.
        num_tiles = max(_cdiv(Bp8, cap), 2 if Bp8 >= 2 * sub else 1)
        tm = _round_up(_cdiv(Bp8, num_tiles), sub)
        Bp = tm * num_tiles
        xp = jnp.pad(input_, ((0, Bp - B), (0, self._kp0 - K)))

        vmem_limit, fused_budget = _vmem_budgets()

        # VMEM footprint estimate for the fused path.
        weight_copies = 1 if _SINGLE_BUFFER_OK else 2
        act_bytes = jnp.dtype(xp.dtype).itemsize
        est = 2 * tm * self._kp0 * act_bytes                       # double-buffered input
        max_np = 0
        for wp, bp in self._padded:
            est += weight_copies * (wp.size * wp.dtype.itemsize
                                    + bp.size * bp.dtype.itemsize)
            max_np = max(max_np, wp.shape[1])
        est += 2 * tm * self._padded[-1][0].shape[1] * act_bytes   # double-buffered output
        est += 6 * tm * max_np                                     # live f32/bf16 temporaries

        if (not force_per_layer) and est <= fused_budget:
            out_p = _fused_forward(xp, self._padded, tm=tm, vmem_limit=vmem_limit)
        else:
            # TODO(synk): stream weights inside a single kernel (emit_pipeline) to
            # avoid per-layer HBM round-trips of the activation.
            act = xp
            for wp, bp in self._padded:
                act = _pallas_linear_tiled(act, wp, bp, tm=tm, vmem_limit=vmem_limit)
            out_p = act

        return out_p[:B, :self.n_hidden[-1]]

    def reference(self, x):
        """Pure-JAX f32 reference for correctness checking."""
        if x.ndim == 2:
            input_ = x
        else:
            input_ = x.reshape(x.shape[0], -1)
        for w, b in self.params:
            input_ = input_ @ w + b
        return input_


if __name__ == "__main__":
    key = jax.random.PRNGKey(0)
    k_x, k_params = jax.random.split(key)

    # Small NCHW input consistent with the module's flatten-then-FC forward.
    B, C, H, W = 2, 4, 16, 16
    n_input = C * H * W          # 1024
    n_hidden = 32
    n_layers = 2

    x = jax.random.normal(k_x, (B, C, H, W), jnp.float32)

    model = FullyConnect(n_input, n_hidden, n_layers, key=k_params)
    ref = model.reference(x)

    # Main path: fully fused (single pallas_call, bf16 MXU operands, f32 accumulate).
    out = jax.block_until_ready(model(x))
    assert out.shape == (B, n_hidden), out.shape
    assert jnp.allclose(out, ref, atol=3e-2, rtol=3e-2), "fused kernel mismatch vs reference"

    # Fallback path (per-layer M/N/K-tiled kernels) — exercised for coverage.
    out_fb = jax.block_until_ready(model(x, force_per_layer=True))
    assert out_fb.shape == (B, n_hidden), out_fb.shape
    assert jnp.allclose(out_fb, ref, atol=3e-2, rtol=3e-2), "tiled kernel mismatch vs reference"

    print("KERNEL_OK")
</pallas_src>

<mosaic_0001>
module attributes {stable_mosaic.version = 11 : i64} {
  func.func @_fused_kernel(%arg0: i32, %arg1: memref<8x1024xf32, #tpu.memory_space<vmem>>, %arg2: memref<1024x128xbf16, #tpu.memory_space<vmem>>, %arg3: memref<1x128xf32, #tpu.memory_space<vmem>>, %arg4: memref<128x128xbf16, #tpu.memory_space<vmem>>, %arg5: memref<1x128xf32, #tpu.memory_space<vmem>>, %arg6: memref<8x128xf32, #tpu.memory_space<vmem>>) attributes {dimension_semantics = [#tpu.dimension_semantics<parallel>], iteration_bounds = array<i64: 1>, scalar_prefetch = 0 : i64, scratch_operands = 0 : i64, tpu.core_type = #tpu.core_type<tc>, window_params = [{transform_indices = @transform_0, window_bounds = array<i64: 8, 1024>}, {pipeline_mode = #tpu.pipeline_mode<synchronous>, transform_indices = @transform_1, window_bounds = array<i64: 1024, 128>}, {pipeline_mode = #tpu.pipeline_mode<synchronous>, transform_indices = @transform_2, window_bounds = array<i64: 1, 128>}, {pipeline_mode = #tpu.pipeline_mode<synchronous>, transform_indices = @transform_3, window_bounds = array<i64: 128, 128>}, {pipeline_mode = #tpu.pipeline_mode<synchronous>, transform_indices = @transform_4, window_bounds = array<i64: 1, 128>}, {transform_indices = @transform_5, window_bounds = array<i64: 8, 128>}]} {
    %c0 = arith.constant 0 : index
    %c0_0 = arith.constant 0 : index
    %0 = vector.load %arg1[%c0, %c0_0] : memref<8x1024xf32, #tpu.memory_space<vmem>>, vector<8x1024xf32>
    %1 = arith.truncf %0 : vector<8x1024xf32> to vector<8x1024xbf16>
    %c0_1 = arith.constant 0 : index
    %c0_2 = arith.constant 0 : index
    %2 = vector.load %arg2[%c0_1, %c0_2] : memref<1024x128xbf16, #tpu.memory_space<vmem>>, vector<1024x128xbf16>
    %c0_3 = arith.constant 0 : index
    %c0_4 = arith.constant 0 : index
    %3 = vector.load %arg3[%c0_3, %c0_4] : memref<1x128xf32, #tpu.memory_space<vmem>>, vector<1x128xf32>
    %cst = arith.constant dense<0.000000e+00> : vector<8x128xf32>
    %4 = tpu.matmul %1, %2, %cst {dimension_numbers = #tpu.dot_dimension_numbers<[1], [0], [0], [1], [0, 0, 1, 1], [], []>} : vector<8x1024xbf16>, vector<1024x128xbf16>, vector<8x128xf32> -> vector<8x128xf32>
    %5 = vector.broadcast %3 : vector<1x128xf32> to vector<8x128xf32>
    %6 = arith.addf %4, %5 : vector<8x128xf32>
    %7 = arith.truncf %6 : vector<8x128xf32> to vector<8x128xbf16>
    %c0_5 = arith.constant 0 : index
    %c0_6 = arith.constant 0 : index
    %8 = vector.load %arg4[%c0_5, %c0_6] : memref<128x128xbf16, #tpu.memory_space<vmem>>, vector<128x128xbf16>
    %c0_7 = arith.constant 0 : index
    %c0_8 = arith.constant 0 : index
    %9 = vector.load %arg5[%c0_7, %c0_8] : memref<1x128xf32, #tpu.memory_space<vmem>>, vector<1x128xf32>
    %cst_9 = arith.constant dense<0.000000e+00> : vector<8x128xf32>
    %10 = tpu.matmul %7, %8, %cst_9 {dimension_numbers = #tpu.dot_dimension_numbers<[1], [0], [0], [1], [0, 0, 1, 1], [], []>} : vector<8x128xbf16>, vector<128x128xbf16>, vector<8x128xf32> -> vector<8x128xf32>
    %11 = vector.broadcast %9 : vector<1x128xf32> to vector<8x128xf32>
    %12 = arith.addf %10, %11 : vector<8x128xf32>
    %c0_10 = arith.constant 0 : index
    %c0_11 = arith.constant 0 : index
    %13 = vector.load %arg6[%c0_10, %c0_11] : memref<8x128xf32, #tpu.memory_space<vmem>>, vector<8x128xf32>
    tpu.vector_store %arg6[%c0_10, %c0_11], %12 {strides = array<i32>} : memref<8x128xf32, #tpu.memory_space<vmem>>, vector<8x128xf32>,
    return
  }
  func.func @transform_0(%arg0: i32) -> (i32, i32) {
    %c0_i32 = arith.constant 0 : i32
    %c0_i32_0 = arith.constant 0 : i32
    return %arg0, %c0_i32 : i32, i32
  }
  func.func @transform_1(%arg0: i32) -> (i32, i32) {
    %c0_i32 = arith.constant 0 : i32
    %c0_i32_0 = arith.constant 0 : i32
    %c0_i32_1 = arith.constant 0 : i32
    return %c0_i32, %c0_i32_0 : i32, i32
  }
  func.func @transform_2(%arg0: i32) -> (i32, i32) {
    %c0_i32 = arith.constant 0 : i32
    %c0_i32_0 = arith.constant 0 : i32
    %c0_i32_1 = arith.constant 0 : i32
    return %c0_i32, %c0_i32_0 : i32, i32
  }
  func.func @transform_3(%arg0: i32) -> (i32, i32) {
    %c0_i32 = arith.constant 0 : i32
    %c0_i32_0 = arith.constant 0 : i32
    %c0_i32_1 = arith.constant 0 : i32
    return %c0_i32, %c0_i32_0 : i32, i32
  }
  func.func @transform_4(%arg0: i32) -> (i32, i32) {
    %c0_i32 = arith.constant 0 : i32
    %c0_i32_0 = arith.constant 0 : i32
    %c0_i32_1 = arith.constant 0 : i32
    return %c0_i32, %c0_i32_0 : i32, i32
  }
  func.func @transform_5(%arg0: i32) -> (i32, i32) {
    %c0_i32 = arith.constant 0 : i32
    %c0_i32_0 = arith.constant 0 : i32
    return %arg0, %c0_i32 : i32, i32
  }
}

module attributes {stable_mosaic.version = 11 : i64} {
  func.func @_fused_kernel(%arg0: i32, %arg1: memref<8x1024xf32, #tpu.memory_space<vmem>>, %arg2: memref<1024x128xbf16, #tpu.memory_space<vmem>>, %arg3: memref<1x128xf32, #tpu.memory_space<vmem>>, %arg4: memref<128x128xbf16, #tpu.memory_space<vmem>>, %arg5: memref<1x128xf32, #tpu.memory_space<vmem>>, %arg6: memref<8x128xf32, #tpu.memory_space<vmem>>) attributes {dimension_semantics = [#tpu.dimension_semantics<parallel>], iteration_bounds = array<i64: 1>, scalar_prefetch = 0 : i64, scratch_operands = 0 : i64, tpu.core_type = #tpu.core_type<tc>, window_params = [{transform_indices = @transform_0, window_bounds = array<i64: 8, 1024>}, {pipeline_mode = #tpu.pipeline_mode<synchronous>, transform_indices = @transform_1, window_bounds = array<i64: 1024, 128>}, {pipeline_mode = #tpu.pipeline_mode<synchronous>, transform_indices = @transform_2, window_bounds = array<i64: 1, 128>}, {pipeline_mode = #tpu.pipeline_mode<synchronous>, transform_indices = @transform_3, window_bounds = array<i64: 128, 128>}, {pipeline_mode = #tpu.pipeline_mode<synchronous>, transform_indices = @transform_4, window_bounds = array<i64: 1, 128>}, {transform_indices = @transform_5, window_bounds = array<i64: 8, 128>}]} {
    %c0 = arith.constant 0 : index
    %c0_0 = arith.constant 0 : index
    %0 = vector.load %arg1[%c0, %c0_0] : memref<8x1024xf32, #tpu.memory_space<vmem>>, vector<8x1024xf32>
    %1 = arith.truncf %0 : vector<8x1024xf32> to vector<8x1024xbf16>
    %c0_1 = arith.constant 0 : index
    %c0_2 = arith.constant 0 : index
    %2 = vector.load %arg2[%c0_1, %c0_2] : memref<1024x128xbf16, #tpu.memory_space<vmem>>, vector<1024x128xbf16>
    %c0_3 = arith.constant 0 : index
    %c0_4 = arith.constant 0 : index
    %3 = vector.load %arg3[%c0_3, %c0_4] : memref<1x128xf32, #tpu.memory_space<vmem>>, vector<1x128xf32>
    %cst = arith.constant dense<0.000000e+00> : vector<8x128xf32>
    %4 = tpu.matmul %1, %2, %cst {dimension_numbers = #tpu.dot_dimension_numbers<[1], [0], [0], [1], [0, 0, 1, 1], [], []>} : vector<8x1024xbf16>, vector<1024x128xbf16>, vector<8x128xf32> -> vector<8x128xf32>
    %5 = vector.broadcast %3 : vector<1x128xf32> to vector<8x128xf32>
    %6 = arith.addf %4, %5 : vector<8x128xf32>
    %7 = arith.truncf %6 : vector<8x128xf32> to vector<8x128xbf16>
    %c0_5 = arith.constant 0 : index
    %c0_6 = arith.constant 0 : index
    %8 = vector.load %arg4[%c0_5, %c0_6] : memref<128x128xbf16, #tpu.memory_space<vmem>>, vector<128x128xbf16>
    %c0_7 = arith.constant 0 : index
    %c0_8 = arith.constant 0 : index
    %9 = vector.load %arg5[%c0_7, %c0_8] : memref<1x128xf32, #tpu.memory_space<vmem>>, vector<1x128xf32>
    %cst_9 = arith.constant dense<0.000000e+00> : vector<8x128xf32>
    %10 = tpu.matmul %7, %8, %cst_9 {dimension_numbers = #tpu.dot_dimension_numbers<[1], [0], [0], [1], [0, 0, 1, 1], [], []>} : vector<8x128xbf16>, vector<128x128xbf16>, vector<8x128xf32> -> vector<8x128xf32>
    %11 = vector.broadcast %9 : vector<1x128xf32> to vector<8x128xf32>
    %12 = arith.addf %10, %11 : vector<8x128xf32>
    %c0_10 = arith.constant 0 : index
    %c0_11 = arith.constant 0 : index
    %13 = vector.load %arg6[%c0_10, %c0_11] : memref<8x128xf32, #tpu.memory_space<vmem>>, vector<8x128xf32>
    tpu.vector_store %arg6[%c0_10, %c0_11], %12 {strides = array<i32>} : memref<8x128xf32, #tpu.memory_space<vmem>>, vector<8x128xf32>,
    return
  }
  func.func @transform_0(%arg0: i32) -> (i32, i32) {
    %c0_i32 = arith.constant 0 : i32
    %c0_i32_0 = arith.constant 0 : i32
    return %arg0, %c0_i32 : i32, i32
  }
  func.func @transform_1(%arg0: i32) -> (i32, i32) {
    %c0_i32 = arith.constant 0 : i32
    %c0_i32_0 = arith.constant 0 : i32
    %c0_i32_1 = arith.constant 0 : i32
    return %c0_i32, %c0_i32_0 : i32, i32
  }
  func.func @transform_2(%arg0: i32) -> (i32, i32) {
    %c0_i32 = arith.constant 0 : i32
    %c0_i32_0 = arith.constant 0 : i32
    %c0_i32_1 = arith.constant 0 : i32
    return %c0_i32, %c0_i32_0 : i32, i32
  }
  func.func @transform_3(%arg0: i32) -> (i32, i32) {
    %c0_i32 = arith.constant 0 : i32
    %c0_i32_0 = arith.constant 0 : i32
    %c0_i32_1 = arith.constant 0 : i32
    return %c0_i32, %c0_i32_0 : i32, i32
  }
  func.func @transform_4(%arg0: i32) -> (i32, i32) {
    %c0_i32 = arith.constant 0 : i32
    %c0_i32_0 = arith.constant 0 : i32
    %c0_i32_1 = arith.constant 0 : i32
    return %c0_i32, %c0_i32_0 : i32, i32
  }
  func.func @transform_5(%arg0: i32) -> (i32, i32) {
    %c0_i32 = arith.constant 0 : i32
    %c0_i32_0 = arith.constant 0 : i32
    return %arg0, %c0_i32 : i32, i32
  }
}

</mosaic_0001>

<bundles_post_ra>
// kernel: tpu_custom_call.1
= control target key start
LH: loop header
LB: loop body
LE: loop exit
PB: predicated region body
PF: predicated region fallthrough
CT: control target
= control target key end

     0   :  { %10 = vsyncpa [#allocation3], 0  ;;  %s1348_s0 = inlined_call_operand.hbm [shape: f32[8,1024], index: 0, kind: input, shape index: {}]   ;;  %s1349_s1 = inlined_call_operand.hbm [shape: bf16[1024,128], index: 1, kind: input, shape index: {}]   ;;  %s1350_s2 = inlined_call_operand.vmem [shape: f32[1,128], index: 2, kind: input, shape index: {}]   ;;  %s1351_s3 = inlined_call_operand.hbm [shape: bf16[128,128], index: 3, kind: input, shape index: {}]   ;;  %s1352_s4 = inlined_call_operand.vmem [shape: f32[1,128], index: 4, kind: input, shape index: {}]   ;;  %s1353_s5 = inlined_call_operand.hbm [shape: f32[8,128], index: 5, kind: output, shape index: {}]  }
   0x1   :  { %11 = vsyncpa [#allocation6], 0 }
   0x2   :  { %12 = vsyncpa [#allocation4], 0  ;;  %s1250_s18 = smov [#allocation5]   ;;  %s1156_s22 = scalar_lea.hbm %s1349_s1, 8192 }
   0x3   :  { %s28_s19 = sshll.u32 %s1250_s18, 4  ;;  %p1157_p0 = scmp.ne.s32.totalorder %s1349_s1, %s1156_s22  ;;  %s29_s19 = int_to_ptr.vmem [resolvable:$true] %s28_s19 }
   0x4   :  { %p1160_p1 = scmp.lt.u32.totalorder %s1156_s22, %s1349_s1 }
   0x6   :  { %p1162_p2 = pnand %p1160_p1, %p1157_p0 }
   0x8   :  { %1165 = shalt.err (!%p1162_p2)
}
   0x9   :  { %s1166_s27 = scalar_lea.vmem %s29_s19, 8192  ;;  %p1171_p4 = scmp.lt.s32.totalorder %s29_s19, %s29_s19 }
   0xa   :  { %p1167_p3 = scmp.ne.s32.totalorder %s29_s19, %s1166_s27  ;;  %p1172_p5 = scmp.lt.s32.totalorder %s1166_s27, %s1166_s27 }
   0xc   :  { %p1173_p6 = por %p1172_p5, %p1171_p4 }
   0xe   :  { %p1174_p7 = pnand %p1173_p6, %p1167_p3 }
  0x10   :  { %1177 = shalt.err (!%p1174_p7)
}
  0x11   :  { %s1251_s28 = smov 64   ;;  %s1252_s29 = smov 4  }
  0x12   :  { %34 = dma.hbm_to_vmem [thread:$0]  %s1349_s1, 8192, %s29_s19, [#allocation6], %s1251_s28, %s1251_s28, %s1252_s29  }
  0x13   :  { %s1253_s7 = smov [#allocation2]   ;;  %s1254_s9 = smov [#allocation7]  }
  0x14   :  { %s19_s8 = sshll.u32 %s1253_s7, 4  ;;  %s42_s10 = sshll.u32 %s1254_s9, 4  ;;  %s20_s8 = int_to_ptr.vmem [resolvable:$true] %s19_s8  ;;  %s43_s10 = int_to_ptr.vmem [resolvable:$true] %s42_s10 }
  0x15   :  { %s1178_s13 = scalar_lea.hbm %s1348_s0, 1024 }
  0x16   :  { %p1179_p8 = scmp.ne.s32.totalorder %s1348_s0, %s1178_s13  ;;  %p1182_p9 = scmp.lt.u32.totalorder %s1178_s13, %s1348_s0 }
  0x18   :  { %p1184_p10 = pnand %p1182_p9, %p1179_p8 }
  0x1a   :  { %1187 = shalt.err (!%p1184_p10)
}
  0x1b   :  { %s1188_s1 = scalar_lea.vmem %s20_s8, 1024  ;;  %p1193_p12 = scmp.lt.s32.totalorder %s20_s8, %s20_s8 }
  0x1c   :  { %p1189_p11 = scmp.ne.s32.totalorder %s20_s8, %s1188_s1  ;;  %p1194_p13 = scmp.lt.s32.totalorder %s1188_s1, %s1188_s1 }
  0x1e   :  { %p1195_p0 = por %p1194_p13, %p1193_p12 }
  0x20   :  { %p1196_p1 = pnand %p1195_p0, %p1189_p11 }
  0x22   :  { %1199 = shalt.err (!%p1196_p1)
}
  0x23   :  { %22 = dma.hbm_to_vmem [thread:$0]  %s1348_s0, 1024, %s20_s8, [#allocation3]  }
  0x24   :  { %s1200_s22 = scalar_lea.hbm %s1351_s3, 1024 }
  0x25   :  { %p1201_p2 = scmp.ne.s32.totalorder %s1351_s3, %s1200_s22  ;;  %p1204_p3 = scmp.lt.u32.totalorder %s1200_s22, %s1351_s3 }
  0x27   :  { %p1206_p4 = pnand %p1204_p3, %p1201_p2 }
  0x29   :  { %1209 = shalt.err (!%p1206_p4)
}
  0x2a   :  { %s1210_s27 = scalar_lea.vmem %s43_s10, 1024  ;;  %p1215_p6 = scmp.lt.s32.totalorder %s43_s10, %s43_s10 }
  0x2b   :  { %p1211_p5 = scmp.ne.s32.totalorder %s43_s10, %s1210_s27  ;;  %p1216_p7 = scmp.lt.s32.totalorder %s1210_s27, %s1210_s27 }
  0x2d   :  { %p1217_p8 = por %p1216_p7, %p1215_p6 }
  0x2f   :  { %p1218_p9 = pnand %p1217_p8, %p1211_p5 }
  0x31   :  { %1221 = shalt.err (!%p1218_p9)
}
  0x32   :  { %48 = dma.hbm_to_vmem [thread:$0]  %s1351_s3, 1024, %s43_s10, [#allocation6], %s1251_s28, %s1251_s28, %s1252_s29  }
  0x33   :  { %1244 = dma.done.wait [#allocation3], 1024  }
  0x34   :  { %1245 = vsyncadd [#allocation3], 4294966272 }
  0x35   :  { %1246 = dma.done.wait [#allocation6], 9216  }
  0x36   :  { %1247 = vsyncadd [#allocation6], 4294958080  ;;  %v1084_v0 = vld [vmem:[#allocation5 + $0x40] sm:$0xff]   ;;  %v1088_v4 = vld [vmem:[#allocation5 + $0x48] sm:$0xff]   ;;  %vm1256_vm0 = vmmov 0   ;;  %s1257_s6 = smov [#allocation8]  }
  0x37   :  { %v1085_v1 = vld [vmem:[#allocation5 + $0xc0] sm:$0xff]   ;;  %959 = vmatprep.subr.bf16.mxu0 %v1084_v0  ;;  %v1089_v5 = vld [vmem:[#allocation5 + $0xc8] sm:$0xff]   ;;  %v1092_v8 = vld [vmem:[#allocation5 + $0x50] sm:$0xff]   ;;  %s875_s7 = sshll.u32 %s1257_s6, 4  ;;  %s876_s7 = int_to_ptr.vmem [resolvable:$true] %s875_s7 }
  0x38   :  { %v1086_v2 = vld [vmem:[#allocation5] sm:$0xff]   ;;  %981 = vmatprep.subr.bf16.mxu1 %v1085_v1  ;;  %v1090_v6 = vld [vmem:[#allocation5 + $0x8] sm:$0xff]   ;;  %v1093_v9 = vld [vmem:[#allocation5 + $0xd0] sm:$0xff]   ;;  %s1222_s8 = scalar_lea.vmem %s876_s7, 128  ;;  %p1227_p11 = scmp.lt.s32.totalorder %s876_s7, %s876_s7 }
  0x39   :  { %v1087_v3 = vld [vmem:[#allocation5 + $0x80] sm:$0xff]   ;;  %960 = vmatpush3.bf16.msra.mxu0 %v1086_v2  ;;  %v1091_v7 = vld [vmem:[#allocation5 + $0x88] sm:$0xff]   ;;  %v1094_v10 = vld [vmem:[#allocation5 + $0x10] sm:$0xff]   ;;  %p1223_p10 = scmp.ne.s32.totalorder %s876_s7, %s1222_s8  ;;  %p1228_p12 = scmp.lt.s32.totalorder %s1222_s8, %s1222_s8 }
  0x3a   :  { %982 = vmatpush3.bf16.msra.mxu1 %v1087_v3  ;;  %961 = vmatprep.subr.bf16.mxu0 %v1088_v4  ;;  %v1095_v11 = vld [vmem:[#allocation5 + $0x90] sm:$0xff]   ;;  %v1096_v12 = vld [vmem:[#allocation5 + $0x58] sm:$0xff]   ;;  %v1100_v16 = vld [vmem:[#allocation5 + $0x60] sm:$0xff]  }
  0x3b   :  { %983 = vmatprep.subr.bf16.mxu1 %v1089_v5  ;;  %v1097_v13 = vld [vmem:[#allocation5 + $0xd8] sm:$0xff]   ;;  %v1101_v17 = vld [vmem:[#allocation5 + $0xe0] sm:$0xff]   ;;  %v1104_v20 = vld [vmem:[#allocation5 + $0x68] sm:$0xff]   ;;  %p1229_p13 = por %p1228_p12, %p1227_p11 }
  0x3c   :  { %v1098_v14 = vld [vmem:[#allocation5 + $0x18] sm:$0xff]   ;;  %v1102_v18 = vld [vmem:[#allocation5 + $0x20] sm:$0xff]   ;;  %v1105_v21 = vld [vmem:[#allocation5 + $0xe8] sm:$0xff]  }
  0x3d   :  { %962 = vmatpush3.bf16.msra.mxu0 %v1090_v6  ;;  %v1099_v15 = vld [vmem:[#allocation5 + $0x98] sm:$0xff]   ;;  %v1103_v19 = vld [vmem:[#allocation5 + $0xa0] sm:$0xff]   ;;  %v1106_v22 = vld [vmem:[#allocation5 + $0x28] sm:$0xff]   ;;  %p1230_p0 = pnand %p1229_p13, %p1223_p10 }
  0x3e   :  { %984 = vmatpush3.bf16.msra.mxu1 %v1091_v7  ;;  %963 = vmatprep.subr.bf16.mxu0 %v1092_v8  ;;  %v1107_v23 = vld [vmem:[#allocation5 + $0xa8] sm:$0xff]   ;;  %v1108_v24 = vld [vmem:[#allocation5 + $0x70] sm:$0xff]   ;;  %v1112_v28 = vld [vmem:[#allocation5 + $0x78] sm:$0xff]  }
  0x3f   :  { %985 = vmatprep.subr.bf16.mxu1 %v1093_v9  ;;  %v1109_v25 = vld [vmem:[#allocation5 + $0xf0] sm:$0xff]   ;;  %v1113_v29 = vld [vmem:[#allocation5 + $0xf8] sm:$0xff]   ;;  %v62_v32 = vld [vmem:[#allocation2 + $0x8] sm:$0xff] }
  0x40   :  { %v1110_v26 = vld [vmem:[#allocation5 + $0x30] sm:$0xff]   ;;  %v1114_v30 = vld [vmem:[#allocation5 + $0x38] sm:$0xff]   ;;  %v61_v34 = vld [vmem:[#allocation2] sm:$0xff]  ;;  %v70_v35 = vpack.c.bf16 %v62_v32, %v62_v32 }
  0x41   :  { %964 = vmatpush3.bf16.msra.mxu0 %v1094_v10  ;;  %v1111_v27 = vld [vmem:[#allocation5 + $0xb0] sm:$0xff]   ;;  %v1115_v31 = vld [vmem:[#allocation5 + $0xb8] sm:$0xff]   ;;  %v69_v37 = vpack.c.bf16 %v61_v34, %v61_v34  ;;  %v1116_v40 = vld [vmem:[#allocation5 + $0x140] sm:$0xff]  }
  0x42   :  { %986 = vmatpush3.bf16.msra.mxu1 %v1095_v11  ;;  %965 = vmatprep.subr.bf16.mxu0 %v1096_v12  ;;  %v64_v33 = vld [vmem:[#allocation2 + $0x18] sm:$0xff]  ;;  %v63_v38 = vld [vmem:[#allocation2 + $0x10] sm:$0xff]  ;;  %v1117_v41 = vld [vmem:[#allocation5 + $0x1c0] sm:$0xff]  }
  0x43   :  { %987 = vmatprep.subr.bf16.mxu1 %v1097_v13  ;;  %v72_v36 = vpack.c.bf16 %v64_v33, %v64_v33  ;;  %v71_v39 = vpack.c.bf16 %v63_v38, %v63_v38  ;;  %628 = vmatprep.mubr.bf16.mxu0 %v70_v35  ;;  %v1118_v42 = vld [vmem:[#allocation5 + $0x100] sm:$0xff]   ;;  %v1120_v44 = vld [vmem:[#allocation5 + $0x148] sm:$0xff]   ;;  %v1124_v48 = vld [vmem:[#allocation5 + $0x150] sm:$0xff]  }
  0x44   :  { %v1119_v43 = vld [vmem:[#allocation5 + $0x180] sm:$0xff]   ;;  %v1121_v45 = vld [vmem:[#allocation5 + $0x1c8] sm:$0xff]   ;;  %v1125_v49 = vld [vmem:[#allocation5 + $0x1d0] sm:$0xff]  }
  0x45   :  { %966 = vmatpush3.bf16.msra.mxu0 %v1098_v14  ;;  %668 = vmatprep.mubr.bf16.mxu1 %v72_v36  ;;  %v1122_v46 = vld [vmem:[#allocation5 + $0x108] sm:$0xff]   ;;  %v1126_v50 = vld [vmem:[#allocation5 + $0x110] sm:$0xff]   ;;  %v1128_v52 = vld [vmem:[#allocation5 + $0x158] sm:$0xff]  }
  0x46   :  { %988 = vmatpush3.bf16.msra.mxu1 %v1099_v15  ;;  %967 = vmatprep.subr.bf16.mxu0 %v1100_v16  ;;  %v1123_v47 = vld [vmem:[#allocation5 + $0x188] sm:$0xff]   ;;  %v1127_v51 = vld [vmem:[#allocation5 + $0x190] sm:$0xff]   ;;  %v1129_v53 = vld [vmem:[#allocation5 + $0x1d8] sm:$0xff]  }
  0x47   :  { %989 = vmatprep.subr.bf16.mxu1 %v1101_v17  ;;  %v1130_v54 = vld [vmem:[#allocation5 + $0x118] sm:$0xff]   ;;  %v1132_v56 = vld [vmem:[#allocation5 + $0x160] sm:$0xff]   ;;  %v1136_v60 = vld [vmem:[#allocation5 + $0x168] sm:$0xff]   ;;  %v1255_v17 = vmov 0.0  }
  0x48   :  { %v1131_v55 = vld [vmem:[#allocation5 + $0x198] sm:$0xff]   ;;  %v1133_v57 = vld [vmem:[#allocation5 + $0x1e0] sm:$0xff]   ;;  %v1137_v61 = vld [vmem:[#allocation5 + $0x1e8] sm:$0xff]  }
  0x49   :  { %968 = vmatpush3.bf16.msra.mxu0 %v1102_v18  ;;  %v1134_v58 = vld [vmem:[#allocation5 + $0x120] sm:$0xff]   ;;  %v1138_v62 = vld [vmem:[#allocation5 + $0x128] sm:$0xff]   ;;  %v1140_v0 = vld [vmem:[#allocation5 + $0x170] sm:$0xff]  }
  0x4a   :  { %990 = vmatpush3.bf16.msra.mxu1 %v1103_v19  ;;  %969 = vmatprep.subr.bf16.mxu0 %v1104_v20  ;;  %v1135_v59 = vld [vmem:[#allocation5 + $0x1a0] sm:$0xff]   ;;  %v1139_v63 = vld [vmem:[#allocation5 + $0x1a8] sm:$0xff]   ;;  %v1141_v1 = vld [vmem:[#allocation5 + $0x1f0] sm:$0xff]  }
  0x4b   :  { %991 = vmatprep.subr.bf16.mxu1 %v1105_v21  ;;  %v1142_v2 = vld [vmem:[#allocation5 + $0x130] sm:$0xff]   ;;  %v1144_v4 = vld [vmem:[#allocation5 + $0x178] sm:$0xff]   ;;  %v66_v8 = vld [vmem:[#allocation2 + $0x28] sm:$0xff] }
  0x4c   :  { %v1143_v3 = vld [vmem:[#allocation5 + $0x1b0] sm:$0xff]   ;;  %v1145_v5 = vld [vmem:[#allocation5 + $0x1f8] sm:$0xff]   ;;  %v74_v10 = vpack.c.bf16 %v66_v8, %v66_v8  ;;  %v65_v12 = vld [vmem:[#allocation2 + $0x20] sm:$0xff] }
  0x4d   :  { %970 = vmatpush3.bf16.msra.mxu0 %v1106_v22  ;;  %v1146_v6 = vld [vmem:[#allocation5 + $0x138] sm:$0xff]   ;;  %v67_v13 = vld [vmem:[#allocation2 + $0x30] sm:$0xff]  ;;  %v73_v14 = vpack.c.bf16 %v65_v12, %v65_v12  ;;  %v1148_v16 = vld [vmem:[#allocation7] sm:$0xff]  }
  0x4e   :  { %992 = vmatpush3.bf16.msra.mxu1 %v1107_v23  ;;  %971 = vmatprep.subr.bf16.mxu0 %v1108_v24  ;;  %v1147_v7 = vld [vmem:[#allocation5 + $0x1b8] sm:$0xff]   ;;  %v75_v15 = vpack.c.bf16 %v67_v13, %v67_v13  ;;  %v1149_v18 = vld [vmem:[#allocation7 + $0x8] sm:$0xff]   ;;  %v1150_v19 = vld [vmem:[#allocation7 + $0x10] sm:$0xff]  }
  0x4f   :  { %993 = vmatprep.subr.bf16.mxu1 %v1109_v25  ;;  %v68_v9 = vld [vmem:[#allocation2 + $0x38] sm:$0xff]  ;;  %v1152_v21 = vld [vmem:[#allocation7 + $0x20] sm:$0xff]   ;;  %v1153_v22 = vld [vmem:[#allocation7 + $0x28] sm:$0xff]  }
  0x50   :  { %v76_v11 = vpack.c.bf16 %v68_v9, %v68_v9  ;;  %v1151_v20 = vld [vmem:[#allocation7 + $0x18] sm:$0xff]   ;;  %v1154_v23 = vld [vmem:[#allocation7 + $0x30] sm:$0xff]  }
  0x51   :  { %972 = vmatpush3.bf16.msra.mxu0 %v1110_v26  ;;  %v1155_v24 = vld [vmem:[#allocation7 + $0x38] sm:$0xff]  }
  0x52   :  { %994 = vmatpush3.bf16.msra.mxu1 %v1111_v27  ;;  %973 = vmatprep.subr.bf16.mxu0 %v1112_v28  ;;  %v885_v27 = vld [vmem:[%s1350_s2] ss:$0 sm:$0xff] }
  0x53   :  { %995 = vmatprep.subr.bf16.mxu1 %v1113_v29 }
  0x55   :  { %974 = vmatpush3.bf16.msra.mxu0 %v1114_v30 }
  0x56   :  { %996 = vmatpush3.bf16.msra.mxu1 %v1115_v31  ;;  %1003 = vmatprep.subr.bf16.mxu0 %v1116_v40 }
  0x57   :  { %1025 = vmatprep.subr.bf16.mxu1 %v1117_v41 }
  0x58   :  { %629 = vmatmul.mubr.bf16.vlgmr.msra.gmra.mrb[0].mxu0 %v69_v37 }
  0x59   :  { %669 = vmatmul.mubr.bf16.vlgmr.msra.gmra.mrb[0].mxu1 %v71_v39  ;;  %1004 = vmatpush3.bf16.msra.mxu0 %v1118_v42 }
  0x5a   :  { %1026 = vmatpush3.bf16.msra.mxu1 %v1119_v43  ;;  %1005 = vmatprep.subr.bf16.mxu0 %v1120_v44 }
  0x5b   :  { %1027 = vmatprep.subr.bf16.mxu1 %v1121_v45  ;;  %708 = vmatprep.mubr.bf16.mxu0 %v74_v10 }
  0x5c   :  { %748 = vmatprep.mubr.bf16.mxu1 %v76_v11 }
  0x5d   :  { %1006 = vmatpush3.bf16.msra.mxu0 %v1122_v46 }
  0x5e   :  { %1028 = vmatpush3.bf16.msra.mxu1 %v1123_v47  ;;  %1007 = vmatprep.subr.bf16.mxu0 %v1124_v48 }
  0x5f   :  { %1029 = vmatprep.subr.bf16.mxu1 %v1125_v49 }
  0x61   :  { %1008 = vmatpush3.bf16.msra.mxu0 %v1126_v50 }
  0x62   :  { %1030 = vmatpush3.bf16.msra.mxu1 %v1127_v51  ;;  %1009 = vmatprep.subr.bf16.mxu0 %v1128_v52  ;;  %v950_v51 = vld [vmem:[%s1352_s4] ss:$0 sm:$0xff] }
  0x63   :  { %1031 = vmatprep.subr.bf16.mxu1 %v1129_v53 }
  0x65   :  { %1010 = vmatpush3.bf16.msra.mxu0 %v1130_v54 }
  0x66   :  { %1032 = vmatpush3.bf16.msra.mxu1 %v1131_v55  ;;  %1011 = vmatprep.subr.bf16.mxu0 %v1132_v56 }
  0x67   :  { %1033 = vmatprep.subr.bf16.mxu1 %v1133_v57 }
  0x69   :  { %1012 = vmatpush3.bf16.msra.mxu0 %v1134_v58 }
  0x6a   :  { %1034 = vmatpush3.bf16.msra.mxu1 %v1135_v59  ;;  %1013 = vmatprep.subr.bf16.mxu0 %v1136_v60 }
  0x6b   :  { %1035 = vmatprep.subr.bf16.mxu1 %v1137_v61 }
  0x6d   :  { %1014 = vmatpush3.bf16.msra.mxu0 %v1138_v62 }
  0x6e   :  { %1036 = vmatpush3.bf16.msra.mxu1 %v1139_v63  ;;  %1015 = vmatprep.subr.bf16.mxu0 %v1140_v0 }
  0x6f   :  { %1037 = vmatprep.subr.bf16.mxu1 %v1141_v1 }
  0x71   :  { %1016 = vmatpush3.bf16.msra.mxu0 %v1142_v2 }
  0x72   :  { %1038 = vmatpush3.bf16.msra.mxu1 %v1143_v3  ;;  %1017 = vmatprep.subr.bf16.mxu0 %v1144_v4 }
  0x73   :  { %1039 = vmatprep.subr.bf16.mxu1 %v1145_v5 }
  0x75   :  { %1018 = vmatpush3.bf16.msra.mxu0 %v1146_v6 }
  0x76   :  { %1040 = vmatpush3.bf16.msra.mxu1 %v1147_v7  ;;  %1056 = vmatprep.subr.bf16.mxu0 %v1255_v17 }
  0x78   :  { %709 = vmatmul.mubr.bf16.vlgmr.msra.gmra.mrb[4].mxu0 %v73_v14 }
  0x79   :  { %749 = vmatmul.mubr.bf16.vlgmr.msra.gmra.mrb[4].mxu1 %v75_v15  ;;  %1057 = vmatpush3.bf16.msra.mxu0 %v1148_v16 }
  0x7a   :  { %1058 = vmatprep.subr.bf16.mxu0 %v1255_v17  ;;  %1072 = vmatprep.mubr.msk.bf16.mxu0 %vm1256_vm0, %v1255_v17 }
  0x7d   :  { %1059 = vmatpush3.bf16.msra.mxu0 %v1149_v18 }
  0x7e   :  { %1060 = vmatprep.subr.bf16.mxu0 %v1255_v17 }
  0x81   :  { %1061 = vmatpush3.bf16.msra.mxu0 %v1150_v19 }
  0x82   :  { %1062 = vmatprep.subr.bf16.mxu0 %v1255_v17 }
  0x85   :  { %1063 = vmatpush3.bf16.msra.mxu0 %v1151_v20 }
  0x86   :  { %1064 = vmatprep.subr.bf16.mxu0 %v1255_v17 }
  0x89   :  { %1065 = vmatpush3.bf16.msra.mxu0 %v1152_v21 }
  0x8a   :  { %1066 = vmatprep.subr.bf16.mxu0 %v1255_v17 }
  0x8d   :  { %1067 = vmatpush3.bf16.msra.mxu0 %v1153_v22 }
  0x8e   :  { %1068 = vmatprep.subr.bf16.mxu0 %v1255_v17 }
  0x91   :  { %1069 = vmatpush3.bf16.msra.mxu0 %v1154_v23 }
  0x92   :  { %1070 = vmatprep.subr.bf16.mxu0 %v1255_v17 }
  0x95   :  { %1071 = vmatpush3.bf16.msra.mxu0 %v1155_v24 }
 0x12b   :  { %v975_v25 = vpop.f32.mrb[0].mxu0 }
 0x12c   :  { %v997_v26 = vpop.f32.mrb[0].mxu1  ;;  %v976_v28 = vpop.f32.mrb[1].mxu0 }
 0x12d   :  { %v998_v29 = vpop.f32.mrb[1].mxu1  ;;  %v977_v30 = vadd.f32 %v976_v28, %v975_v25  ;;  %v978_v32 = vpop.f32.mrb[2].mxu0 }
 0x12e   :  { %v999_v31 = vadd.f32 %v998_v29, %v997_v26  ;;  %v1000_v33 = vpop.f32.mrb[2].mxu1  ;;  %v979_v34 = vpop.f32.mrb[3].mxu0 }
 0x12f   :  { %v1001_v35 = vpop.f32.mrb[3].mxu1  ;;  %v631_v36 = vadd.f32 %v977_v30, %v885_v27 }
 0x131   :  { %v671_v37 = vadd.f32 %v999_v31, %v631_v36 }
 0x14b   :  { %v1019_v38 = vpop.f32.mrb[4].mxu0 }
 0x14c   :  { %v1041_v39 = vpop.f32.mrb[4].mxu1  ;;  %v1020_v40 = vpop.f32.mrb[5].mxu0 }
 0x14d   :  { %v1021_v41 = vadd.f32 %v1020_v40, %v1019_v38  ;;  %v1042_v42 = vpop.f32.mrb[5].mxu1  ;;  %v1022_v43 = vpop.f32.mrb[6].mxu0 }
 0x14e   :  { %v1043_v44 = vadd.f32 %v1042_v42, %v1041_v39  ;;  %v1044_v45 = vpop.f32.mrb[6].mxu1  ;;  %v1023_v46 = vpop.f32.mrb[7].mxu0 }
 0x14f   :  { %v711_v47 = vadd.f32 %v1021_v41, %v671_v37  ;;  %v1045_v48 = vpop.f32.mrb[7].mxu1 }
 0x151   :  { %v751_v49 = vadd.f32 %v1043_v44, %v711_v47 }
 0x153   :  { %v756_v50 = vpack.c.bf16 %v751_v49, %v751_v49 }
 0x155   :  { %1073 = vmatmul.mubr.bf16.vlgmr.msra.gmra.mrb[8].mxu0 %v756_v50 }
 0x228   :  { %v862_v52 = vpop.f32.mrb[8].mxu0 }
 0x229   :  { %v863_v53 = vadd.f32 %v950_v51, %v862_v52  ;;  %v1074_v54 = vpop.f32.mrb[9].mxu0 }
 0x22a   :  { %v865_v55 = vpop.f32.mrb[10].mxu0 }
 0x22b   :  { %868 = vst [vmem:[#allocation8] sm:$0xff] %v863_v53  ;;  %v1075_v56 = vpop.f32.mrb[11].mxu0 }
 0x22c   :  { %1233 = shalt.err (!%p1230_p0)
}
 0x22d   :  { %s1234_s4 = scalar_lea.hbm %s1353_s5, 128 }
 0x22e   :  { %p1235_p1 = scmp.ne.s32.totalorder %s1353_s5, %s1234_s4  ;;  %p1238_p2 = scmp.lt.u32.totalorder %s1234_s4, %s1353_s5 }
 0x230   :  { %p1240_p3 = pnand %p1238_p2, %p1235_p1 }
 0x232   :  { %1243 = shalt.err (!%p1240_p3)
}
 0x233   :  { %878 = dma.vmem_to_hbm [thread:$0]  %s876_s7, 128, %s1353_s5, [#allocation4]  }
 0x234   :  { %1248 = dma.done.wait [#allocation4], 128  }
 0x235   :  { %1249 = vsyncadd [#allocation4], 4294967168 }
 0x236   :  { %882 = vsyncpa [#allocation3], 1 }
 0x237   :  { %883 = vsyncpa [#allocation6], 1 }
 0x238   :  { %884 = vsyncpa [#allocation4], 1 }

// kernel: tpu_custom_call.1
= control target key start
LH: loop header
LB: loop body
LE: loop exit
PB: predicated region body
PF: predicated region fallthrough
CT: control target
= control target key end

     0   :  { %10 = vsyncpa [#allocation3], 0  ;;  %s1348_s0 = inlined_call_operand.hbm [shape: f32[8,1024], index: 0, kind: input, shape index: {}]   ;;  %s1349_s1 = inlined_call_operand.hbm [shape: bf16[1024,128], index: 1, kind: input, shape index: {}]   ;;  %s1350_s2 = inlined_call_operand.vmem [shape: f32[1,128], index: 2, kind: input, shape index: {}]   ;;  %s1351_s3 = inlined_call_operand.hbm [shape: bf16[128,128], index: 3, kind: input, shape index: {}]   ;;  %s1352_s4 = inlined_call_operand.vmem [shape: f32[1,128], index: 4, kind: input, shape index: {}]   ;;  %s1353_s5 = inlined_call_operand.hbm [shape: f32[8,128], index: 5, kind: output, shape index: {}]  }
   0x1   :  { %11 = vsyncpa [#allocation6], 0 }
   0x2   :  { %12 = vsyncpa [#allocation4], 0  ;;  %s1250_s18 = smov [#allocation5]   ;;  %s1156_s22 = scalar_lea.hbm %s1349_s1, 8192 }
   0x3   :  { %s28_s19 = sshll.u32 %s1250_s18, 4  ;;  %p1157_p0 = scmp.ne.s32.totalorder %s1349_s1, %s1156_s22  ;;  %s29_s19 = int_to_ptr.vmem [resolvable:$true] %s28_s19 }
   0x4   :  { %p1160_p1 = scmp.lt.u32.totalorder %s1156_s22, %s1349_s1 }
   0x6   :  { %p1162_p2 = pnand %p1160_p1, %p1157_p0 }
   0x8   :  { %1165 = shalt.err (!%p1162_p2)
}
   0x9   :  { %s1166_s27 = scalar_lea.vmem %s29_s19, 8192  ;;  %p1171_p4 = scmp.lt.s32.totalorder %s29_s19, %s29_s19 }
   0xa   :  { %p1167_p3 = scmp.ne.s32.totalorder %s29_s19, %s1166_s27  ;;  %p1172_p5 = scmp.lt.s32.totalorder %s1166_s27, %s1166_s27 }
   0xc   :  { %p1173_p6 = por %p1172_p5, %p1171_p4 }
   0xe   :  { %p1174_p7 = pnand %p1173_p6, %p1167_p3 }
  0x10   :  { %1177 = shalt.err (!%p1174_p7)
}
  0x11   :  { %s1251_s28 = smov 64   ;;  %s1252_s29 = smov 4  }
  0x12   :  { %34 = dma.hbm_to_vmem [thread:$0]  %s1349_s1, 8192, %s29_s19, [#allocation6], %s1251_s28, %s1251_s28, %s1252_s29  }
  0x13   :  { %s1253_s7 = smov [#allocation2]   ;;  %s1254_s9 = smov [#allocation7]  }
  0x14   :  { %s19_s8 = sshll.u32 %s1253_s7, 4  ;;  %s42_s10 = sshll.u32 %s1254_s9, 4  ;;  %s20_s8 = int_to_ptr.vmem [resolvable:$true] %s19_s8  ;;  %s43_s10 = int_to_ptr.vmem [resolvable:$true] %s42_s10 }
  0x15   :  { %s1178_s13 = scalar_lea.hbm %s1348_s0, 1024 }
  0x16   :  { %p1179_p8 = scmp.ne.s32.totalorder %s1348_s0, %s1178_s13  ;;  %p1182_p9 = scmp.lt.u32.totalorder %s1178_s13, %s1348_s0 }
  0x18   :  { %p1184_p10 = pnand %p1182_p9, %p1179_p8 }
  0x1a   :  { %1187 = shalt.err (!%p1184_p10)
}
  0x1b   :  { %s1188_s1 = scalar_lea.vmem %s20_s8, 1024  ;;  %p1193_p12 = scmp.lt.s32.totalorder %s20_s8, %s20_s8 }
  0x1c   :  { %p1189_p11 = scmp.ne.s32.totalorder %s20_s8, %s1188_s1  ;;  %p1194_p13 = scmp.lt.s32.totalorder %s1188_s1, %s1188_s1 }
  0x1e   :  { %p1195_p0 = por %p1194_p13, %p1193_p12 }
  0x20   :  { %p1196_p1 = pnand %p1195_p0, %p1189_p11 }
  0x22   :  { %1199 = shalt.err (!%p1196_p1)
}
  0x23   :  { %22 = dma.hbm_to_vmem [thread:$0]  %s1348_s0, 1024, %s20_s8, [#allocation3]  }
  0x24   :  { %s1200_s22 = scalar_lea.hbm %s1351_s3, 1024 }
  0x25   :  { %p1201_p2 = scmp.ne.s32.totalorder %s1351_s3, %s1200_s22  ;;  %p1204_p3 = scmp.lt.u32.totalorder %s1200_s22, %s1351_s3 }
  0x27   :  { %p1206_p4 = pnand %p1204_p3, %p1201_p2 }
  0x29   :  { %1209 = shalt.err (!%p1206_p4)
}
  0x2a   :  { %s1210_s27 = scalar_lea.vmem %s43_s10, 1024  ;;  %p1215_p6 = scmp.lt.s32.totalorder %s43_s10, %s43_s10 }
  0x2b   :  { %p1211_p5 = scmp.ne.s32.totalorder %s43_s10, %s1210_s27  ;;  %p1216_p7 = scmp.lt.s32.totalorder %s1210_s27, %s1210_s27 }
  0x2d   :  { %p1217_p8 = por %p1216_p7, %p1215_p6 }
  0x2f   :  { %p1218_p9 = pnand %p1217_p8, %p1211_p5 }
  0x31   :  { %1221 = shalt.err (!%p1218_p9)
}
  0x32   :  { %48 = dma.hbm_to_vmem [thread:$0]  %s1351_s3, 1024, %s43_s10, [#allocation6], %s1251_s28, %s1251_s28, %s1252_s29  }
  0x33   :  { %1244 = dma.done.wait [#allocation3], 1024  }
  0x34   :  { %1245 = vsyncadd [#allocation3], 4294966272 }
  0x35   :  { %1246 = dma.done.wait [#allocation6], 9216  }
  0x36   :  { %1247 = vsyncadd [#allocation6], 4294958080  ;;  %v1084_v0 = vld [vmem:[#allocation5 + $0x40] sm:$0xff]   ;;  %v1088_v4 = vld [vmem:[#allocation5 + $0x48] sm:$0xff]   ;;  %vm1256_vm0 = vmmov 0   ;;  %s1257_s6 = smov [#allocation8]  }
  0x37   :  { %v1085_v1 = vld [vmem:[#allocation5 + $0xc0] sm:$0xff]   ;;  %959 = vmatprep.subr.bf16.mxu0 %v1084_v0  ;;  %v1089_v5 = vld [vmem:[#allocation5 + $0xc8] sm:$0xff]   ;;  %v1092_v8 = vld [vmem:[#allocation5 + $0x50] sm:$0xff]   ;;  %s875_s7 = sshll.u32 %s1257_s6, 4  ;;  %s876_s7 = int_to_ptr.vmem [resolvable:$true] %s875_s7 }
  0x38   :  { %v1086_v2 = vld [vmem:[#allocation5] sm:$0xff]   ;;  %981 = vmatprep.subr.bf16.mxu1 %v1085_v1  ;;  %v1090_v6 = vld [vmem:[#allocation5 + $0x8] sm:$0xff]   ;;  %v1093_v9 = vld [vmem:[#allocation5 + $0xd0] sm:$0xff]   ;;  %s1222_s8 = scalar_lea.vmem %s876_s7, 128  ;;  %p1227_p11 = scmp.lt.s32.totalorder %s876_s7, %s876_s7 }
  0x39   :  { %v1087_v3 = vld [vmem:[#allocation5 + $0x80] sm:$0xff]   ;;  %960 = vmatpush3.bf16.msra.mxu0 %v1086_v2  ;;  %v1091_v7 = vld [vmem:[#allocation5 + $0x88] sm:$0xff]   ;;  %v1094_v10 = vld [vmem:[#allocation5 + $0x10] sm:$0xff]   ;;  %p1223_p10 = scmp.ne.s32.totalorder %s876_s7, %s1222_s8  ;;  %p1228_p12 = scmp.lt.s32.totalorder %s1222_s8, %s1222_s8 }
  0x3a   :  { %982 = vmatpush3.bf16.msra.mxu1 %v1087_v3  ;;  %961 = vmatprep.subr.bf16.mxu0 %v1088_v4  ;;  %v1095_v11 = vld [vmem:[#allocation5 + $0x90] sm:$0xff]   ;;  %v1096_v12 = vld [vmem:[#allocation5 + $0x58] sm:$0xff]   ;;  %v1100_v16 = vld [vmem:[#allocation5 + $0x60] sm:$0xff]  }
  0x3b   :  { %983 = vmatprep.subr.bf16.mxu1 %v1089_v5  ;;  %v1097_v13 = vld [vmem:[#allocation5 + $0xd8] sm:$0xff]   ;;  %v1101_v17 = vld [vmem:[#allocation5 + $0xe0] sm:$0xff]   ;;  %v1104_v20 = vld [vmem:[#allocation5 + $0x68] sm:$0xff]   ;;  %p1229_p13 = por %p1228_p12, %p1227_p11 }
  0x3c   :  { %v1098_v14 = vld [vmem:[#allocation5 + $0x18] sm:$0xff]   ;;  %v1102_v18 = vld [vmem:[#allocation5 + $0x20] sm:$0xff]   ;;  %v1105_v21 = vld [vmem:[#allocation5 + $0xe8] sm:$0xff]  }
  0x3d   :  { %962 = vmatpush3.bf16.msra.mxu0 %v1090_v6  ;;  %v1099_v15 = vld [vmem:[#allocation5 + $0x98] sm:$0xff]   ;;  %v1103_v19 = vld [vmem:[#allocation5 + $0xa0] sm:$0xff]   ;;  %v1106_v22 = vld [vmem:[#allocation5 + $0x28] sm:$0xff]   ;;  %p1230_p0 = pnand %p1229_p13, %p1223_p10 }
  0x3e   :  { %984 = vmatpush3.bf16.msra.mxu1 %v1091_v7  ;;  %963 = vmatprep.subr.bf16.mxu0 %v1092_v8  ;;  %v1107_v23 = vld [vmem:[#allocation5 + $0xa8] sm:$0xff]   ;;  %v1108_v24 = vld [vmem:[#allocation5 + $0x70] sm:$0xff]   ;;  %v1112_v28 = vld [vmem:[#allocation5 + $0x78] sm:$0xff]  }
  0x3f   :  { %985 = vmatprep.subr.bf16.mxu1 %v1093_v9  ;;  %v1109_v25 = vld [vmem:[#allocation5 + $0xf0] sm:$0xff]   ;;  %v1113_v29 = vld [vmem:[#allocation5 + $0xf8] sm:$0xff]   ;;  %v62_v32 = vld [vmem:[#allocation2 + $0x8] sm:$0xff] }
  0x40   :  { %v1110_v26 = vld [vmem:[#allocation5 + $0x30] sm:$0xff]   ;;  %v1114_v30 = vld [vmem:[#allocation5 + $0x38] sm:$0xff]   ;;  %v61_v34 = vld [vmem:[#allocation2] sm:$0xff]  ;;  %v70_v35 = vpack.c.bf16 %v62_v32, %v62_v32 }
  0x41   :  { %964 = vmatpush3.bf16.msra.mxu0 %v1094_v10  ;;  %v1111_v27 = vld [vmem:[#allocation5 + $0xb0] sm:$0xff]   ;;  %v1115_v31 = vld [vmem:[#allocation5 + $0xb8] sm:$0xff]   ;;  %v69_v37 = vpack.c.bf16 %v61_v34, %v61_v34  ;;  %v1116_v40 = vld [vmem:[#allocation5 + $0x140] sm:$0xff]  }
  0x42   :  { %986 = vmatpush3.bf16.msra.mxu1 %v1095_v11  ;;  %965 = vmatprep.subr.bf16.mxu0 %v1096_v12  ;;  %v64_v33 = vld [vmem:[#allocation2 + $0x18] sm:$0xff]  ;;  %v63_v38 = vld [vmem:[#allocation2 + $0x10] sm:$0xff]  ;;  %v1117_v41 = vld [vmem:[#allocation5 + $0x1c0] sm:$0xff]  }
  0x43   :  { %987 = vmatprep.subr.bf16.mxu1 %v1097_v13  ;;  %v72_v36 = vpack.c.bf16 %v64_v33, %v64_v33  ;;  %v71_v39 = vpack.c.bf16 %v63_v38, %v63_v38  ;;  %628 = vmatprep.mubr.bf16.mxu0 %v70_v35  ;;  %v1118_v42 = vld [vmem:[#allocation5 + $0x100] sm:$0xff]   ;;  %v1120_v44 = vld [vmem:[#allocation5 + $0x148] sm:$0xff]   ;;  %v1124_v48 = vld [vmem:[#allocation5 + $0x150] sm:$0xff]  }
  0x44   :  { %v1119_v43 = vld [vmem:[#allocation5 + $0x180] sm:$0xff]   ;;  %v1121_v45 = vld [vmem:[#allocation5 + $0x1c8] sm:$0xff]   ;;  %v1125_v49 = vld [vmem:[#allocation5 + $0x1d0] sm:$0xff]  }
  0x45   :  { %966 = vmatpush3.bf16.msra.mxu0 %v1098_v14  ;;  %668 = vmatprep.mubr.bf16.mxu1 %v72_v36  ;;  %v1122_v46 = vld [vmem:[#allocation5 + $0x108] sm:$0xff]   ;;  %v1126_v50 = vld [vmem:[#allocation5 + $0x110] sm:$0xff]   ;;  %v1128_v52 = vld [vmem:[#allocation5 + $0x158] sm:$0xff]  }
  0x46   :  { %988 = vmatpush3.bf16.msra.mxu1 %v1099_v15  ;;  %967 = vmatprep.subr.bf16.mxu0 %v1100_v16  ;;  %v1123_v47 = vld [vmem:[#allocation5 + $0x188] sm:$0xff]   ;;  %v1127_v51 = vld [vmem:[#allocation5 + $0x190] sm:$0xff]   ;;  %v1129_v53 = vld [vmem:[#allocation5 + $0x1d8] sm:$0xff]  }
  0x47   :  { %989 = vmatprep.subr.bf16.mxu1 %v1101_v17  ;;  %v1130_v54 = vld [vmem:[#allocation5 + $0x118] sm:$0xff]   ;;  %v1132_v56 = vld [vmem:[#allocation5 + $0x160] sm:$0xff]   ;;  %v1136_v60 = vld [vmem:[#allocation5 + $0x168] sm:$0xff]   ;;  %v1255_v17 = vmov 0.0  }
  0x48   :  { %v1131_v55 = vld [vmem:[#allocation5 + $0x198] sm:$0xff]   ;;  %v1133_v57 = vld [vmem:[#allocation5 + $0x1e0] sm:$0xff]   ;;  %v1137_v61 = vld [vmem:[#allocation5 + $0x1e8] sm:$0xff]  }
  0x49   :  { %968 = vmatpush3.bf16.msra.mxu0 %v1102_v18  ;;  %v1134_v58 = vld [vmem:[#allocation5 + $0x120] sm:$0xff]   ;;  %v1138_v62 = vld [vmem:[#allocation5 + $0x128] sm:$0xff]   ;;  %v1140_v0 = vld [vmem:[#allocation5 + $0x170] sm:$0xff]  }
  0x4a   :  { %990 = vmatpush3.bf16.msra.mxu1 %v1103_v19  ;;  %969 = vmatprep.subr.bf16.mxu0 %v1104_v20  ;;  %v1135_v59 = vld [vmem:[#allocation5 + $0x1a0] sm:$0xff]   ;;  %v1139_v63 = vld [vmem:[#allocation5 + $0x1a8] sm:$0xff]   ;;  %v1141_v1 = vld [vmem:[#allocation5 + $0x1f0] sm:$0xff]  }
  0x4b   :  { %991 = vmatprep.subr.bf16.mxu1 %v1105_v21  ;;  %v1142_v2 = vld [vmem:[#allocation5 + $0x130] sm:$0xff]   ;;  %v1144_v4 = vld [vmem:[#allocation5 + $0x178] sm:$0xff]   ;;  %v66_v8 = vld [vmem:[#allocation2 + $0x28] sm:$0xff] }
  0x4c   :  { %v1143_v3 = vld [vmem:[#allocation5 + $0x1b0] sm:$0xff]   ;;  %v1145_v5 = vld [vmem:[#allocation5 + $0x1f8] sm:$0xff]   ;;  %v74_v10 = vpack.c.bf16 %v66_v8, %v66_v8  ;;  %v65_v12 = vld [vmem:[#allocation2 + $0x20] sm:$0xff] }
  0x4d   :  { %970 = vmatpush3.bf16.msra.mxu0 %v1106_v22  ;;  %v1146_v6 = vld [vmem:[#allocation5 + $0x138] sm:$0xff]   ;;  %v67_v13 = vld [vmem:[#allocation2 + $0x30] sm:$0xff]  ;;  %v73_v14 = vpack.c.bf16 %v65_v12, %v65_v12  ;;  %v1148_v16 = vld [vmem:[#allocation7] sm:$0xff]  }
  0x4e   :  { %992 = vmatpush3.bf16.msra.mxu1 %v1107_v23  ;;  %971 = vmatprep.subr.bf16.mxu0 %v1108_v24  ;;  %v1147_v7 = vld [vmem:[#allocation5 + $0x1b8] sm:$0xff]   ;;  %v75_v15 = vpack.c.bf16 %v67_v13, %v67_v13  ;;  %v1149_v18 = vld [vmem:[#allocation7 + $0x8] sm:$0xff]   ;;  %v1150_v19 = vld [vmem:[#allocation7 + $0x10] sm:$0xff]  }
  0x4f   :  { %993 = vmatprep.subr.bf16.mxu1 %v1109_v25  ;;  %v68_v9 = vld [vmem:[#allocation2 + $0x38] sm:$0xff]  ;;  %v1152_v21 = vld [vmem:[#allocation7 + $0x20] sm:$0xff]   ;;  %v1153_v22 = vld [vmem:[#allocation7 + $0x28] sm:$0xff]  }
  0x50   :  { %v76_v11 = vpack.c.bf16 %v68_v9, %v68_v9  ;;  %v1151_v20 = vld [vmem:[#allocation7 + $0x18] sm:$0xff]   ;;  %v1154_v23 = vld [vmem:[#allocation7 + $0x30] sm:$0xff]  }
  0x51   :  { %972 = vmatpush3.bf16.msra.mxu0 %v1110_v26  ;;  %v1155_v24 = vld [vmem:[#allocation7 + $0x38] sm:$0xff]  }
  0x52   :  { %994 = vmatpush3.bf16.msra.mxu1 %v1111_v27  ;;  %973 = vmatprep.subr.bf16.mxu0 %v1112_v28  ;;  %v885_v27 = vld [vmem:[%s1350_s2] ss:$0 sm:$0xff] }
  0x53   :  { %995 = vmatprep.subr.bf16.mxu1 %v1113_v29 }
  0x55   :  { %974 = vmatpush3.bf16.msra.mxu0 %v1114_v30 }
  0x56   :  { %996 = vmatpush3.bf16.msra.mxu1 %v1115_v31  ;;  %1003 = vmatprep.subr.bf16.mxu0 %v1116_v40 }
  0x57   :  { %1025 = vmatprep.subr.bf16.mxu1 %v1117_v41 }
  0x58   :  { %629 = vmatmul.mubr.bf16.vlgmr.msra.gmra.mrb[0].mxu0 %v69_v37 }
  0x59   :  { %669 = vmatmul.mubr.bf16.vlgmr.msra.gmra.mrb[0].mxu1 %v71_v39  ;;  %1004 = vmatpush3.bf16.msra.mxu0 %v1118_v42 }
  0x5a   :  { %1026 = vmatpush3.bf16.msra.mxu1 %v1119_v43  ;;  %1005 = vmatprep.subr.bf16.mxu0 %v1120_v44 }
  0x5b   :  { %1027 = vmatprep.subr.bf16.mxu1 %v1121_v45  ;;  %708 = vmatprep.mubr.bf16.mxu0 %v74_v10 }
  0x5c   :  { %748 = vmatprep.mubr.bf16.mxu1 %v76_v11 }
  0x5d   :  { %1006 = vmatpush3.bf16.msra.mxu0 %v1122_v46 }
  0x5e   :  { %1028 = vmatpush3.bf16.msra.mxu1 %v1123_v47  ;;  %1007 = vmatprep.subr.bf16.mxu0 %v1124_v48 }
  0x5f   :  { %1029 = vmatprep.subr.bf16.mxu1 %v1125_v49 }
  0x61   :  { %1008 = vmatpush3.bf16.msra.mxu0 %v1126_v50 }
  0x62   :  { %1030 = vmatpush3.bf16.msra.mxu1 %v1127_v51  ;;  %1009 = vmatprep.subr.bf16.mxu0 %v1128_v52  ;;  %v950_v51 = vld [vmem:[%s1352_s4] ss:$0 sm:$0xff] }
  0x63   :  { %1031 = vmatprep.subr.bf16.mxu1 %v1129_v53 }
  0x65   :  { %1010 = vmatpush3.bf16.msra.mxu0 %v1130_v54 }
  0x66   :  { %1032 = vmatpush3.bf16.msra.mxu1 %v1131_v55  ;;  %1011 = vmatprep.subr.bf16.mxu0 %v1132_v56 }
  0x67   :  { %1033 = vmatprep.subr.bf16.mxu1 %v1133_v57 }
  0x69   :  { %1012 = vmatpush3.bf16.msra.mxu0 %v1134_v58 }
  0x6a   :  { %1034 = vmatpush3.bf16.msra.mxu1 %v1135_v59  ;;  %1013 = vmatprep.subr.bf16.mxu0 %v1136_v60 }
  0x6b   :  { %1035 = vmatprep.subr.bf16.mxu1 %v1137_v61 }
  0x6d   :  { %1014 = vmatpush3.bf16.msra.mxu0 %v1138_v62 }
  0x6e   :  { %1036 = vmatpush3.bf16.msra.mxu1 %v1139_v63  ;;  %1015 = vmatprep.subr.bf16.mxu0 %v1140_v0 }
  0x6f   :  { %1037 = vmatprep.subr.bf16.mxu1 %v1141_v1 }
  0x71   :  { %1016 = vmatpush3.bf16.msra.mxu0 %v1142_v2 }
  0x72   :  { %1038 = vmatpush3.bf16.msra.mxu1 %v1143_v3  ;;  %1017 = vmatprep.subr.bf16.mxu0 %v1144_v4 }
  0x73   :  { %1039 = vmatprep.subr.bf16.mxu1 %v1145_v5 }
  0x75   :  { %1018 = vmatpush3.bf16.msra.mxu0 %v1146_v6 }
  0x76   :  { %1040 = vmatpush3.bf16.msra.mxu1 %v1147_v7  ;;  %1056 = vmatprep.subr.bf16.mxu0 %v1255_v17 }
  0x78   :  { %709 = vmatmul.mubr.bf16.vlgmr.msra.gmra.mrb[4].mxu0 %v73_v14 }
  0x79   :  { %749 = vmatmul.mubr.bf16.vlgmr.msra.gmra.mrb[4].mxu1 %v75_v15  ;;  %1057 = vmatpush3.bf16.msra.mxu0 %v1148_v16 }
  0x7a   :  { %1058 = vmatprep.subr.bf16.mxu0 %v1255_v17  ;;  %1072 = vmatprep.mubr.msk.bf16.mxu0 %vm1256_vm0, %v1255_v17 }
  0x7d   :  { %1059 = vmatpush3.bf16.msra.mxu0 %v1149_v18 }
  0x7e   :  { %1060 = vmatprep.subr.bf16.mxu0 %v1255_v17 }
  0x81   :  { %1061 = vmatpush3.bf16.msra.mxu0 %v1150_v19 }
  0x82   :  { %1062 = vmatprep.subr.bf16.mxu0 %v1255_v17 }
  0x85   :  { %1063 = vmatpush3.bf16.msra.mxu0 %v1151_v20 }
  0x86   :  { %1064 = vmatprep.subr.bf16.mxu0 %v1255_v17 }
  0x89   :  { %1065 = vmatpush3.bf16.msra.mxu0 %v1152_v21 }
  0x8a   :  { %1066 = vmatprep.subr.bf16.mxu0 %v1255_v17 }
  0x8d   :  { %1067 = vmatpush3.bf16.msra.mxu0 %v1153_v22 }
  0x8e   :  { %1068 = vmatprep.subr.bf16.mxu0 %v1255_v17 }
  0x91   :  { %1069 = vmatpush3.bf16.msra.mxu0 %v1154_v23 }
  0x92   :  { %1070 = vmatprep.subr.bf16.mxu0 %v1255_v17 }
  0x95   :  { %1071 = vmatpush3.bf16.msra.mxu0 %v1155_v24 }
 0x12b   :  { %v975_v25 = vpop.f32.mrb[0].mxu0 }
 0x12c   :  { %v997_v26 = vpop.f32.mrb[0].mxu1  ;;  %v976_v28 = vpop.f32.mrb[1].mxu0 }
 0x12d   :  { %v998_v29 = vpop.f32.mrb[1].mxu1  ;;  %v977_v30 = vadd.f32 %v976_v28, %v975_v25  ;;  %v978_v32 = vpop.f32.mrb[2].mxu0 }
 0x12e   :  { %v999_v31 = vadd.f32 %v998_v29, %v997_v26  ;;  %v1000_v33 = vpop.f32.mrb[2].mxu1  ;;  %v979_v34 = vpop.f32.mrb[3].mxu0 }
 0x12f   :  { %v1001_v35 = vpop.f32.mrb[3].mxu1  ;;  %v631_v36 = vadd.f32 %v977_v30, %v885_v27 }
 0x131   :  { %v671_v37 = vadd.f32 %v999_v31, %v631_v36 }
 0x14b   :  { %v1019_v38 = vpop.f32.mrb[4].mxu0 }
 0x14c   :  { %v1041_v39 = vpop.f32.mrb[4].mxu1  ;;  %v1020_v40 = vpop.f32.mrb[5].mxu0 }
 0x14d   :  { %v1021_v41 = vadd.f32 %v1020_v40, %v1019_v38  ;;  %v1042_v42 = vpop.f32.mrb[5].mxu1  ;;  %v1022_v43 = vpop.f32.mrb[6].mxu0 }
 0x14e   :  { %v1043_v44 = vadd.f32 %v1042_v42, %v1041_v39  ;;  %v1044_v45 = vpop.f32.mrb[6].mxu1  ;;  %v1023_v46 = vpop.f32.mrb[7].mxu0 }
 0x14f   :  { %v711_v47 = vadd.f32 %v1021_v41, %v671_v37  ;;  %v1045_v48 = vpop.f32.mrb[7].mxu1 }
 0x151   :  { %v751_v49 = vadd.f32 %v1043_v44, %v711_v47 }
 0x153   :  { %v756_v50 = vpack.c.bf16 %v751_v49, %v751_v49 }
 0x155   :  { %1073 = vmatmul.mubr.bf16.vlgmr.msra.gmra.mrb[8].mxu0 %v756_v50 }
 0x228   :  { %v862_v52 = vpop.f32.mrb[8].mxu0 }
 0x229   :  { %v863_v53 = vadd.f32 %v950_v51, %v862_v52  ;;  %v1074_v54 = vpop.f32.mrb[9].mxu0 }
 0x22a   :  { %v865_v55 = vpop.f32.mrb[10].mxu0 }
 0x22b   :  { %868 = vst [vmem:[#allocation8] sm:$0xff] %v863_v53  ;;  %v1075_v56 = vpop.f32.mrb[11].mxu0 }
 0x22c   :  { %1233 = shalt.err (!%p1230_p0)
}
 0x22d   :  { %s1234_s4 = scalar_lea.hbm %s1353_s5, 128 }
 0x22e   :  { %p1235_p1 = scmp.ne.s32.totalorder %s1353_s5, %s1234_s4  ;;  %p1238_p2 = scmp.lt.u32.totalorder %s1234_s4, %s1353_s5 }
 0x230   :  { %p1240_p3 = pnand %p1238_p2, %p1235_p1 }
 0x232   :  { %1243 = shalt.err (!%p1240_p3)
}
 0x233   :  { %878 = dma.vmem_to_hbm [thread:$0]  %s876_s7, 128, %s1353_s5, [#allocation4]  }
 0x234   :  { %1248 = dma.done.wait [#allocation4], 128  }
 0x235   :  { %1249 = vsyncadd [#allocation4], 4294967168 }
 0x236   :  { %882 = vsyncpa [#allocation3], 1 }
 0x237   :  { %883 = vsyncpa [#allocation6], 1 }
 0x238   :  { %884 = vsyncpa [#allocation4], 1 }

</bundles_post_ra>
